<compile_context>
chip_gen: v7x
topology: tpu7x:2x2x1
jax: 0.10.0
libtpu: 0.0.40
codegen_flags: <defaults>
</compile_context>

<pallas_src>
import functools

import jax
import jax.numpy as jnp
from jax.experimental import pallas as pl
from jax.experimental.pallas import tpu as pltpu


_CLS_PAD = 128   # lane-dense padding of the 2-wide domain-classifier output


def _round_up(x, m):
    return ((x + m - 1) // m) * m


def _cdiv(a, b):
    return -(-a // b)


def _vmem_capacity_bytes():
    """Per-core VMEM capacity; conservative fallback if the query fails."""
    try:
        return int(pltpu.get_tpu_info().vmem_capacity_bytes)
    except Exception:
        return 64 * 1024 * 1024   # assume v7x-class worst case (64 MiB / core)


# -----------------------------------------------------------------------------
# Pallas kernel: one batch tile of the full I_DArec forward.
# -----------------------------------------------------------------------------
def _idarec_kernel(
    x_ref,                      # [TB, n_users_pad]              f32
    w_enc_ref, b_enc_ref,       # [n_users_pad, F] bf16, [1, F]  f32
    w_rpe_ref, b_rpe_ref,       # [F, H] bf16,        [1, H]     f32
    w_h1_ref, b_h1_ref,         # dc1|sr1|tr1 fused: [H, 3*half_pad] bf16, [1, 3*half_pad] f32
    w_dc2_ref, b_dc2_ref,       # [half_pad, 128] bf16, [1, 128] f32
    w_s2_ref, b_s2_ref,         # [half_pad, half_pad] bf16, [1, half_pad] f32
    w_t2_ref, b_t2_ref,         # [half_pad, half_pad] bf16, [1, half_pad] f32
    w_s3_ref, b_s3_ref,         # [half_pad, n_users_pad] bf16, [1, n_users_pad] f32
    w_t3_ref, b_t3_ref,         # [half_pad, n_users_pad] bf16, [1, n_users_pad] f32
    cls_ref,                    # out: [TB, 128]          f32
    sp_ref,                     # out: [TB, n_users_pad]  f32
    tp_ref,                     # out: [TB, n_users_pad]  f32
    *, half_pad,
):
    f32 = jnp.float32
    bf16 = jnp.bfloat16

    x = x_ref[...].astype(bf16)

    # Frozen I_AutoRec encoder: embedding = sigmoid(x @ Wenc + benc)
    emb = jax.nn.sigmoid(
        jnp.dot(x, w_enc_ref[...], preferred_element_type=f32) + b_enc_ref[...])

    # RPE: feature = relu(emb @ Wrpe + brpe)
    feat = jnp.maximum(
        jnp.dot(emb.astype(bf16), w_rpe_ref[...], preferred_element_type=f32)
        + b_rpe_ref[...], 0.0)

    # Fused first layer of the three heads (dense fusion, 128-aligned segments).
    z1 = (jnp.dot(feat.astype(bf16), w_h1_ref[...], preferred_element_type=f32)
          + b_h1_ref[...])
    dc_h = jax.nn.sigmoid(z1[:, :half_pad])
    s_h1 = jnp.maximum(z1[:, half_pad:2 * half_pad], 0.0)
    t_h1 = jnp.maximum(z1[:, 2 * half_pad:], 0.0)

    # Domain classifier head (output padded 2 -> 128 for an unmasked store).
    cls_ref[...] = jax.nn.sigmoid(
        jnp.dot(dc_h.astype(bf16), w_dc2_ref[...], preferred_element_type=f32)
        + b_dc2_ref[...]).astype(cls_ref.dtype)

    # Source rating predictor (dense weights; no block-diagonal zeros).
    s_h2 = jnp.maximum(
        jnp.dot(s_h1.astype(bf16), w_s2_ref[...], preferred_element_type=f32)
        + b_s2_ref[...], 0.0)
    sp_ref[...] = (
        jnp.dot(s_h2.astype(bf16), w_s3_ref[...], preferred_element_type=f32)
        + b_s3_ref[...]).astype(sp_ref.dtype)

    # Target rating predictor.
    t_h2 = jnp.maximum(
        jnp.dot(t_h1.astype(bf16), w_t2_ref[...], preferred_element_type=f32)
        + b_t2_ref[...], 0.0)
    tp_ref[...] = (
        jnp.dot(t_h2.astype(bf16), w_t3_ref[...], preferred_element_type=f32)
        + b_t3_ref[...]).astype(tp_ref.dtype)


# -----------------------------------------------------------------------------
# Raw parameter construction (PyTorch Linear layout: W [out, in], b [out]).
# -----------------------------------------------------------------------------
def init_params(key, n_users, S_n_items, T_n_items, n_factors, rpe_hidden):
    del S_n_items, T_n_items  # item counts don't affect the forward weight shapes
    half = rpe_hidden // 2

    def linear(key, out_f, in_f, scale=0.1):
        kw, kb = jax.random.split(key)
        w = scale * jax.random.normal(kw, (out_f, in_f), jnp.float32)
        b = scale * jax.random.normal(kb, (out_f,), jnp.float32)
        return w, b

    keys = jax.random.split(key, 12)
    p = {}
    p["S_enc_w"], p["S_enc_b"] = linear(keys[0], n_factors, n_users)
    p["T_enc_w"], p["T_enc_b"] = linear(keys[1], n_factors, n_users)
    p["rpe_w"], p["rpe_b"] = linear(keys[2], rpe_hidden, n_factors)
    p["dc1_w"], p["dc1_b"] = linear(keys[3], half, rpe_hidden)
    p["dc2_w"], p["dc2_b"] = linear(keys[4], 2, half)
    p["sr1_w"], p["sr1_b"] = linear(keys[5], half, rpe_hidden)
    p["sr2_w"], p["sr2_b"] = linear(keys[6], half, half)
    p["sr3_w"], p["sr3_b"] = linear(keys[7], n_users, half)
    p["tr1_w"], p["tr1_b"] = linear(keys[8], half, rpe_hidden)
    p["tr2_w"], p["tr2_b"] = linear(keys[9], half, half)
    p["tr3_w"], p["tr3_b"] = linear(keys[10], n_users, half)
    return p


# -----------------------------------------------------------------------------
# One-time parameter prep: transpose to [in, out], fuse head entry, pad to 128
# lanes, cast weights to bf16 (biases stay f32 and are added to f32 accum).
# -----------------------------------------------------------------------------
def prepare_params(raw, weight_dtype=jnp.bfloat16):
    n_factors, n_users = raw["S_enc_w"].shape          # PyTorch layout [out, in]
    rpe_hidden = raw["rpe_w"].shape[0]
    half = raw["dc1_w"].shape[0]
    n_users_pad = _round_up(n_users, 128)
    half_pad = _round_up(half, 128)

    def t(w):                                          # [out, in] -> [in, out] f32
        return jnp.transpose(jnp.asarray(w, jnp.float32))

    def b2(b):                                         # [out] -> [1, out] f32
        return jnp.asarray(b, jnp.float32).reshape(1, -1)

    def pad_to(a, rows, cols):
        out = jnp.zeros((rows, cols), jnp.float32)
        return out.at[:a.shape[0], :a.shape[1]].set(a)

    p = {}
    # Encoders (padded users -> zero rows, inert against zero-padded x columns).
    p["S_enc_w"] = pad_to(t(raw["S_enc_w"]), n_users_pad, n_factors).astype(weight_dtype)
    p["S_enc_b"] = b2(raw["S_enc_b"])
    p["T_enc_w"] = pad_to(t(raw["T_enc_w"]), n_users_pad, n_factors).astype(weight_dtype)
    p["T_enc_b"] = b2(raw["T_enc_b"])

    p["w_rpe"] = t(raw["rpe_w"]).astype(weight_dtype)
    p["b_rpe"] = b2(raw["rpe_b"])

    # Fused head entry [H, 3*half_pad]; each segment starts on a 128-lane boundary.
    w_h1 = jnp.zeros((rpe_hidden, 3 * half_pad), jnp.float32)
    b_h1 = jnp.zeros((1, 3 * half_pad), jnp.float32)
    for k, name in enumerate(("dc1", "sr1", "tr1")):
        w_h1 = w_h1.at[:, k * half_pad:k * half_pad + half].set(t(raw[name + "_w"]))
        b_h1 = b_h1.at[:, k * half_pad:k * half_pad + half].set(b2(raw[name + "_b"]))
    p["w_h1"] = w_h1.astype(weight_dtype)
    p["b_h1"] = b_h1

    # DC second layer: rows padded to half_pad (zero rows absorb sigmoid(0)=0.5
    # padding of dc_h), columns padded 2 -> 128 for a lane-dense store.
    p["w_dc2"] = pad_to(t(raw["dc2_w"]), half_pad, _CLS_PAD).astype(weight_dtype)
    p["b_dc2"] = pad_to(b2(raw["dc2_b"]), 1, _CLS_PAD)

    # S/T second layers: dense [half_pad, half_pad] (no block-diagonal fusion).
    p["w_s2"] = pad_to(t(raw["sr2_w"]), half_pad, half_pad).astype(weight_dtype)
    p["b_s2"] = pad_to(b2(raw["sr2_b"]), 1, half_pad)
    p["w_t2"] = pad_to(t(raw["tr2_w"]), half_pad, half_pad).astype(weight_dtype)
    p["b_t2"] = pad_to(b2(raw["tr2_b"]), 1, half_pad)

    # S/T output layers: dense [half_pad, n_users_pad] (no block-diagonal zeros).
    p["w_s3"] = pad_to(t(raw["sr3_w"]), half_pad, n_users_pad).astype(weight_dtype)
    p["b_s3"] = pad_to(b2(raw["sr3_b"]), 1, n_users_pad)
    p["w_t3"] = pad_to(t(raw["tr3_w"]), half_pad, n_users_pad).astype(weight_dtype)
    p["b_t3"] = pad_to(b2(raw["tr3_b"]), 1, n_users_pad)
    return p


# -----------------------------------------------------------------------------
# Forward wrapper: batch-tiled pallas_call with VMEM-resident bf16 weights.
# -----------------------------------------------------------------------------
@functools.partial(jax.jit, static_argnames=("n_users", "is_source"))
def idarec_forward(rating_matrix, prepared, n_users, is_source):
    B, n_users_in = rating_matrix.shape
    n_users_pad = prepared["S_enc_w"].shape[0]
    half_pad = prepared["w_dc2"].shape[0]
    cls_pad = prepared["w_dc2"].shape[1]
    F = prepared["w_rpe"].shape[0]
    H = prepared["w_rpe"].shape[1]

    if is_source:
        enc_w, enc_b = prepared["S_enc_w"], prepared["S_enc_b"]
    else:
        enc_w, enc_b = prepared["T_enc_w"], prepared["T_enc_b"]

    weights = (
        enc_w, enc_b,
        prepared["w_rpe"], prepared["b_rpe"],
        prepared["w_h1"], prepared["b_h1"],
        prepared["w_dc2"], prepared["b_dc2"],
        prepared["w_s2"], prepared["b_s2"],
        prepared["w_t2"], prepared["b_t2"],
        prepared["w_s3"], prepared["b_s3"],
        prepared["w_t3"], prepared["b_t3"],
    )
    weight_bytes = sum(int(a.size) * a.dtype.itemsize for a in weights)

    # Generation-aware VMEM budget (v5e/v6e: 128 MiB -> ~100 MiB ceiling;
    # v7x: 64 MiB -> ~52 MiB ceiling). Keep budget and requested limit consistent.
    vmem_cap = _vmem_capacity_bytes()
    vmem_ceiling = int(min(vmem_cap - (12 << 20), 100 << 20))
    budget = vmem_ceiling - (8 << 20)          # slack for Mosaic internal scratch

    def working_set(tile):
        # resident weights (default pipeline keeps 2 buffers for each operand)
        ws = 2 * weight_bytes
        # double-buffered streamed tiles: x + 3 outputs (all f32)
        ws += 2 * tile * (3 * n_users_pad + cls_pad) * 4
        # generous estimate of in-kernel f32/bf16 temporaries
        ws += 6 * tile * (2 * n_users_pad + 8 * half_pad + F + H + cls_pad)
        return ws

    # Pick the largest batch tile that fits; floor at 128 (MXU M-dim) — shrink
    # weights, not the batch tile.
    tile_b = 128
    for cand in (512, 256, 128):
        if working_set(cand) <= budget:
            tile_b = cand
            break
    # TODO(synk): if even tile_b=128 overflows the budget (very large n_users on
    # v7x), tile enc_w over a reduction grid axis and w_s3/w_t3 over an output-
    # column axis instead of relying on whole-weight VMEM residency.

    # Never tile larger than the (sublane-rounded) batch, and rebalance so the
    # last tile is mostly full (avoid computing/writing lots of padded rows).
    tile_b = min(tile_b, _round_up(B, 8))
    n_tiles = _cdiv(B, tile_b)
    tile_b = _round_up(_cdiv(B, n_tiles), 8)
    b_pad = n_tiles * tile_b
    grid = (n_tiles,)

    # Only materialize a padded copy of x when shapes require it.
    x = rating_matrix.astype(jnp.float32)
    if (n_users_in != n_users_pad) or (b_pad != B):
        xp = jnp.zeros((b_pad, n_users_pad), jnp.float32)
        x = xp.at[:B, :n_users_in].set(x)

    def resident(a):
        zeros = (0,) * a.ndim
        # Constant index_map: block DMA'd once, VMEM-resident across grid steps.
        return pl.BlockSpec(a.shape, lambda i, _z=zeros: _z)

    in_specs = [pl.BlockSpec((tile_b, n_users_pad), lambda i: (i, 0))]
    in_specs += [resident(a) for a in weights]

    out_specs = (
        pl.BlockSpec((tile_b, cls_pad), lambda i: (i, 0)),
        pl.BlockSpec((tile_b, n_users_pad), lambda i: (i, 0)),
        pl.BlockSpec((tile_b, n_users_pad), lambda i: (i, 0)),
    )
    out_shape = (
        jax.ShapeDtypeStruct((b_pad, cls_pad), jnp.float32),
        jax.ShapeDtypeStruct((b_pad, n_users_pad), jnp.float32),
        jax.ShapeDtypeStruct((b_pad, n_users_pad), jnp.float32),
    )

    cls_p, sp_p, tp_p = pl.pallas_call(
        functools.partial(_idarec_kernel, half_pad=half_pad),
        grid=grid,
        out_shape=out_shape,
        in_specs=in_specs,
        out_specs=out_specs,
        compiler_params=pltpu.CompilerParams(
            dimension_semantics=("parallel",),
            vmem_limit_bytes=vmem_ceiling,
        ),
    )(x, *weights)

    class_output = cls_p[:B, :2]
    source_prediction = sp_p[:B, :n_users]
    target_prediction = tp_p[:B, :n_users]
    return class_output, source_prediction, target_prediction


# -----------------------------------------------------------------------------
# Pure-JAX reference (same math, raw PyTorch-layout f32 params).
# -----------------------------------------------------------------------------
def idarec_reference(x, p, is_source):
    if is_source:
        ew, eb = p["S_enc_w"], p["S_enc_b"]
    else:
        ew, eb = p["T_enc_w"], p["T_enc_b"]
    emb = jax.nn.sigmoid(x @ ew.T + eb)
    feat = jax.nn.relu(emb @ p["rpe_w"].T + p["rpe_b"])
    cls = jax.nn.sigmoid(
        jax.nn.sigmoid(feat @ p["dc1_w"].T + p["dc1_b"]) @ p["dc2_w"].T + p["dc2_b"])
    s = jax.nn.relu(feat @ p["sr1_w"].T + p["sr1_b"])
    s = jax.nn.relu(s @ p["sr2_w"].T + p["sr2_b"])
    s = s @ p["sr3_w"].T + p["sr3_b"]
    t = jax.nn.relu(feat @ p["tr1_w"].T + p["tr1_b"])
    t = jax.nn.relu(t @ p["tr2_w"].T + p["tr2_b"])
    t = t @ p["tr3_w"].T + p["tr3_b"]
    return cls, s, t


if __name__ == "__main__":
    # Small, forward-consistent shapes.
    n_users = 32          # length of each item's rating row
    S_n_items = 64
    T_n_items = 48
    n_factors = 16
    rpe_hidden = 32
    batch = 8             # number of item rows in this forward call

    key = jax.random.PRNGKey(0)
    k_param, k_data = jax.random.split(key)

    raw = init_params(k_param, n_users, S_n_items, T_n_items, n_factors, rpe_hidden)
    prepared = prepare_params(raw)   # one-time: transpose / fuse / pad / bf16-cast

    rating_matrix = jax.random.uniform(
        k_data, (batch, n_users), dtype=jnp.float32, minval=0.0, maxval=5.0)

    def check(out, ref, tol=5e-2):
        # bf16 weights/activations -> tolerance relaxed vs. the pure-f32 path.
        assert out.shape == ref.shape, (out.shape, ref.shape)
        err = float(jnp.max(jnp.abs(out.astype(jnp.float32) - ref)))
        scale = 1.0 + float(jnp.max(jnp.abs(ref)))
        assert err <= tol * scale, (err, scale)

    # Source-domain branch.
    outs = jax.block_until_ready(idarec_forward(rating_matrix, prepared, n_users, True))
    refs = idarec_reference(rating_matrix, raw, True)
    for o, r in zip(outs, refs):
        check(o, r)

    # Target-domain branch.
    outs_t = jax.block_until_ready(idarec_forward(rating_matrix, prepared, n_users, False))
    refs_t = idarec_reference(rating_matrix, raw, False)
    for o, r in zip(outs_t, refs_t):
        check(o, r)

    print("KERNEL_OK")
</pallas_src>

<mosaic_0001>
module attributes {stable_mosaic.version = 11 : i64} {
  func.func @_idarec_kernel(%arg0: i32, %arg1: memref<8x128xf32, #tpu.memory_space<vmem>>, %arg2: memref<128x16xbf16, #tpu.memory_space<vmem>>, %arg3: memref<1x16xf32, #tpu.memory_space<vmem>>, %arg4: memref<16x32xbf16, #tpu.memory_space<vmem>>, %arg5: memref<1x32xf32, #tpu.memory_space<vmem>>, %arg6: memref<32x384xbf16, #tpu.memory_space<vmem>>, %arg7: memref<1x384xf32, #tpu.memory_space<vmem>>, %arg8: memref<128x128xbf16, #tpu.memory_space<vmem>>, %arg9: memref<1x128xf32, #tpu.memory_space<vmem>>, %arg10: memref<128x128xbf16, #tpu.memory_space<vmem>>, %arg11: memref<1x128xf32, #tpu.memory_space<vmem>>, %arg12: memref<128x128xbf16, #tpu.memory_space<vmem>>, %arg13: memref<1x128xf32, #tpu.memory_space<vmem>>, %arg14: memref<128x128xbf16, #tpu.memory_space<vmem>>, %arg15: memref<1x128xf32, #tpu.memory_space<vmem>>, %arg16: memref<128x128xbf16, #tpu.memory_space<vmem>>, %arg17: memref<1x128xf32, #tpu.memory_space<vmem>>, %arg18: memref<8x128xf32, #tpu.memory_space<vmem>>, %arg19: memref<8x128xf32, #tpu.memory_space<vmem>>, %arg20: memref<8x128xf32, #tpu.memory_space<vmem>>) attributes {dimension_semantics = [#tpu.dimension_semantics<parallel>], iteration_bounds = array<i64: 1>, scalar_prefetch = 0 : i64, scratch_operands = 0 : i64, tpu.core_type = #tpu.core_type<tc>, window_params = [{transform_indices = @transform_0, window_bounds = array<i64: 8, 128>}, {pipeline_mode = #tpu.pipeline_mode<synchronous>, transform_indices = @transform_1, window_bounds = array<i64: 128, 16>}, {pipeline_mode = #tpu.pipeline_mode<synchronous>, transform_indices = @transform_2, window_bounds = array<i64: 1, 16>}, {pipeline_mode = #tpu.pipeline_mode<synchronous>, transform_indices = @transform_3, window_bounds = array<i64: 16, 32>}, {pipeline_mode = #tpu.pipeline_mode<synchronous>, transform_indices = @transform_4, window_bounds = array<i64: 1, 32>}, {pipeline_mode = #tpu.pipeline_mode<synchronous>, transform_indices = @transform_5, window_bounds = array<i64: 32, 384>}, {pipeline_mode = #tpu.pipeline_mode<synchronous>, transform_indices = @transform_6, window_bounds = array<i64: 1, 384>}, {pipeline_mode = #tpu.pipeline_mode<synchronous>, transform_indices = @transform_7, window_bounds = array<i64: 128, 128>}, {pipeline_mode = #tpu.pipeline_mode<synchronous>, transform_indices = @transform_8, window_bounds = array<i64: 1, 128>}, {pipeline_mode = #tpu.pipeline_mode<synchronous>, transform_indices = @transform_9, window_bounds = array<i64: 128, 128>}, {pipeline_mode = #tpu.pipeline_mode<synchronous>, transform_indices = @transform_10, window_bounds = array<i64: 1, 128>}, {pipeline_mode = #tpu.pipeline_mode<synchronous>, transform_indices = @transform_11, window_bounds = array<i64: 128, 128>}, {pipeline_mode = #tpu.pipeline_mode<synchronous>, transform_indices = @transform_12, window_bounds = array<i64: 1, 128>}, {pipeline_mode = #tpu.pipeline_mode<synchronous>, transform_indices = @transform_13, window_bounds = array<i64: 128, 128>}, {pipeline_mode = #tpu.pipeline_mode<synchronous>, transform_indices = @transform_14, window_bounds = array<i64: 1, 128>}, {pipeline_mode = #tpu.pipeline_mode<synchronous>, transform_indices = @transform_15, window_bounds = array<i64: 128, 128>}, {pipeline_mode = #tpu.pipeline_mode<synchronous>, transform_indices = @transform_16, window_bounds = array<i64: 1, 128>}, {transform_indices = @transform_17, window_bounds = array<i64: 8, 128>}, {transform_indices = @transform_18, window_bounds = array<i64: 8, 128>}, {transform_indices = @transform_19, window_bounds = array<i64: 8, 128>}]} {
    %c0 = arith.constant 0 : index
    %c0_0 = arith.constant 0 : index
    %0 = vector.load %arg1[%c0, %c0_0] : memref<8x128xf32, #tpu.memory_space<vmem>>, vector<8x128xf32>
    %1 = arith.truncf %0 : vector<8x128xf32> to vector<8x128xbf16>
    %c0_1 = arith.constant 0 : index
    %c0_2 = arith.constant 0 : index
    %2 = vector.load %arg2[%c0_1, %c0_2] : memref<128x16xbf16, #tpu.memory_space<vmem>>, vector<128x16xbf16>
    %cst = arith.constant dense<0.000000e+00> : vector<8x16xf32>
    %3 = tpu.matmul %1, %2, %cst {dimension_numbers = #tpu.dot_dimension_numbers<[1], [0], [0], [1], [0, 0, 1, 1], [], []>} : vector<8x128xbf16>, vector<128x16xbf16>, vector<8x16xf32> -> vector<8x16xf32>
    %c0_3 = arith.constant 0 : index
    %c0_4 = arith.constant 0 : index
    %4 = vector.load %arg3[%c0_3, %c0_4] : memref<1x16xf32, #tpu.memory_space<vmem>>, vector<1x16xf32>
    %5 = vector.broadcast %4 : vector<1x16xf32> to vector<8x16xf32>
    %6 = arith.addf %3, %5 : vector<8x16xf32>
    %7 = arith.negf %6 : vector<8x16xf32>
    %8 = math.exp %7 : vector<8x16xf32>
    %cst_5 = arith.constant 1.000000e+00 : f32
    %9 = vector.broadcast %cst_5 : f32 to vector<8x16xf32>
    %10 = arith.addf %9, %8 : vector<8x16xf32>
    %11 = arith.divf %9, %10 : vector<8x16xf32>
    %12 = arith.truncf %11 : vector<8x16xf32> to vector<8x16xbf16>
    %c0_6 = arith.constant 0 : index
    %c0_7 = arith.constant 0 : index
    %13 = vector.load %arg4[%c0_6, %c0_7] : memref<16x32xbf16, #tpu.memory_space<vmem>>, vector<16x32xbf16>
    %cst_8 = arith.constant dense<0.000000e+00> : vector<8x32xf32>
    %14 = tpu.matmul %12, %13, %cst_8 {dimension_numbers = #tpu.dot_dimension_numbers<[1], [0], [0], [1], [0, 0, 1, 1], [], []>} : vector<8x16xbf16>, vector<16x32xbf16>, vector<8x32xf32> -> vector<8x32xf32>
    %c0_9 = arith.constant 0 : index
    %c0_10 = arith.constant 0 : index
    %15 = vector.load %arg5[%c0_9, %c0_10] : memref<1x32xf32, #tpu.memory_space<vmem>>, vector<1x32xf32>
    %16 = vector.broadcast %15 : vector<1x32xf32> to vector<8x32xf32>
    %17 = arith.addf %14, %16 : vector<8x32xf32>
    %cst_11 = arith.constant 0.000000e+00 : f32
    %18 = vector.broadcast %cst_11 : f32 to vector<8x32xf32>
    %19 = arith.maximumf %17, %18 : vector<8x32xf32>
    %20 = arith.truncf %19 : vector<8x32xf32> to vector<8x32xbf16>
    %c0_12 = arith.constant 0 : index
    %c0_13 = arith.constant 0 : index
    %21 = vector.load %arg6[%c0_12, %c0_13] : memref<32x384xbf16, #tpu.memory_space<vmem>>, vector<32x384xbf16>
    %cst_14 = arith.constant dense<0.000000e+00> : vector<8x384xf32>
    %22 = tpu.matmul %20, %21, %cst_14 {dimension_numbers = #tpu.dot_dimension_numbers<[1], [0], [0], [1], [0, 0, 1, 1], [], []>} : vector<8x32xbf16>, vector<32x384xbf16>, vector<8x384xf32> -> vector<8x384xf32>
    %c0_15 = arith.constant 0 : index
    %c0_16 = arith.constant 0 : index
    %23 = vector.load %arg7[%c0_15, %c0_16] : memref<1x384xf32, #tpu.memory_space<vmem>>, vector<1x384xf32>
    %24 = vector.broadcast %23 : vector<1x384xf32> to vector<8x384xf32>
    %25 = arith.addf %22, %24 : vector<8x384xf32>
    %26 = vector.extract_strided_slice %25 {offsets = [0, 0], sizes = [8, 128], strides = [1, 1]} : vector<8x384xf32> to vector<8x128xf32>
    %27 = arith.negf %26 : vector<8x128xf32>
    %28 = math.exp %27 : vector<8x128xf32>
    %cst_17 = arith.constant 1.000000e+00 : f32
    %29 = vector.broadcast %cst_17 : f32 to vector<8x128xf32>
    %30 = arith.addf %29, %28 : vector<8x128xf32>
    %31 = arith.divf %29, %30 : vector<8x128xf32>
    %32 = vector.extract_strided_slice %25 {offsets = [0, 128], sizes = [8, 128], strides = [1, 1]} : vector<8x384xf32> to vector<8x128xf32>
    %cst_18 = arith.constant 0.000000e+00 : f32
    %33 = vector.broadcast %cst_18 : f32 to vector<8x128xf32>
    %34 = arith.maximumf %32, %33 : vector<8x128xf32>
    %35 = vector.extract_strided_slice %25 {offsets = [0, 256], sizes = [8, 128], strides = [1, 1]} : vector<8x384xf32> to vector<8x128xf32>
    %cst_19 = arith.constant 0.000000e+00 : f32
    %36 = vector.broadcast %cst_19 : f32 to vector<8x128xf32>
    %37 = arith.maximumf %35, %36 : vector<8x128xf32>
    %38 = arith.truncf %31 : vector<8x128xf32> to vector<8x128xbf16>
    %c0_20 = arith.constant 0 : index
    %c0_21 = arith.constant 0 : index
    %39 = vector.load %arg8[%c0_20, %c0_21] : memref<128x128xbf16, #tpu.memory_space<vmem>>, vector<128x128xbf16>
    %cst_22 = arith.constant dense<0.000000e+00> : vector<8x128xf32>
    %40 = tpu.matmul %38, %39, %cst_22 {dimension_numbers = #tpu.dot_dimension_numbers<[1], [0], [0], [1], [0, 0, 1, 1], [], []>} : vector<8x128xbf16>, vector<128x128xbf16>, vector<8x128xf32> -> vector<8x128xf32>
    %c0_23 = arith.constant 0 : index
    %c0_24 = arith.constant 0 : index
    %41 = vector.load %arg9[%c0_23, %c0_24] : memref<1x128xf32, #tpu.memory_space<vmem>>, vector<1x128xf32>
    %42 = vector.broadcast %41 : vector<1x128xf32> to vector<8x128xf32>
    %43 = arith.addf %40, %42 : vector<8x128xf32>
    %44 = arith.negf %43 : vector<8x128xf32>
    %45 = math.exp %44 : vector<8x128xf32>
    %cst_25 = arith.constant 1.000000e+00 : f32
    %46 = vector.broadcast %cst_25 : f32 to vector<8x128xf32>
    %47 = arith.addf %46, %45 : vector<8x128xf32>
    %48 = arith.divf %46, %47 : vector<8x128xf32>
    %c0_26 = arith.constant 0 : index
    %c0_27 = arith.constant 0 : index
    %49 = vector.load %arg18[%c0_26, %c0_27] : memref<8x128xf32, #tpu.memory_space<vmem>>, vector<8x128xf32>
    tpu.vector_store %arg18[%c0_26, %c0_27], %48 {strides = array<i32>} : memref<8x128xf32, #tpu.memory_space<vmem>>, vector<8x128xf32>,
    %50 = arith.truncf %34 : vector<8x128xf32> to vector<8x128xbf16>
    %c0_28 = arith.constant 0 : index
    %c0_29 = arith.constant 0 : index
    %51 = vector.load %arg10[%c0_28, %c0_29] : memref<128x128xbf16, #tpu.memory_space<vmem>>, vector<128x128xbf16>
    %cst_30 = arith.constant dense<0.000000e+00> : vector<8x128xf32>
    %52 = tpu.matmul %50, %51, %cst_30 {dimension_numbers = #tpu.dot_dimension_numbers<[1], [0], [0], [1], [0, 0, 1, 1], [], []>} : vector<8x128xbf16>, vector<128x128xbf16>, vector<8x128xf32> -> vector<8x128xf32>
    %c0_31 = arith.constant 0 : index
    %c0_32 = arith.constant 0 : index
    %53 = vector.load %arg11[%c0_31, %c0_32] : memref<1x128xf32, #tpu.memory_space<vmem>>, vector<1x128xf32>
    %54 = vector.broadcast %53 : vector<1x128xf32> to vector<8x128xf32>
    %55 = arith.addf %52, %54 : vector<8x128xf32>
    %cst_33 = arith.constant 0.000000e+00 : f32
    %56 = vector.broadcast %cst_33 : f32 to vector<8x128xf32>
    %57 = arith.maximumf %55, %56 : vector<8x128xf32>
    %58 = arith.truncf %57 : vector<8x128xf32> to vector<8x128xbf16>
    %c0_34 = arith.constant 0 : index
    %c0_35 = arith.constant 0 : index
    %59 = vector.load %arg14[%c0_34, %c0_35] : memref<128x128xbf16, #tpu.memory_space<vmem>>, vector<128x128xbf16>
    %cst_36 = arith.constant dense<0.000000e+00> : vector<8x128xf32>
    %60 = tpu.matmul %58, %59, %cst_36 {dimension_numbers = #tpu.dot_dimension_numbers<[1], [0], [0], [1], [0, 0, 1, 1], [], []>} : vector<8x128xbf16>, vector<128x128xbf16>, vector<8x128xf32> -> vector<8x128xf32>
    %c0_37 = arith.constant 0 : index
    %c0_38 = arith.constant 0 : index
    %61 = vector.load %arg15[%c0_37, %c0_38] : memref<1x128xf32, #tpu.memory_space<vmem>>, vector<1x128xf32>
    %62 = vector.broadcast %61 : vector<1x128xf32> to vector<8x128xf32>
    %63 = arith.addf %60, %62 : vector<8x128xf32>
    %c0_39 = arith.constant 0 : index
    %c0_40 = arith.constant 0 : index
    %64 = vector.load %arg19[%c0_39, %c0_40] : memref<8x128xf32, #tpu.memory_space<vmem>>, vector<8x128xf32>
    tpu.vector_store %arg19[%c0_39, %c0_40], %63 {strides = array<i32>} : memref<8x128xf32, #tpu.memory_space<vmem>>, vector<8x128xf32>,
    %65 = arith.truncf %37 : vector<8x128xf32> to vector<8x128xbf16>
    %c0_41 = arith.constant 0 : index
    %c0_42 = arith.constant 0 : index
    %66 = vector.load %arg12[%c0_41, %c0_42] : memref<128x128xbf16, #tpu.memory_space<vmem>>, vector<128x128xbf16>
    %cst_43 = arith.constant dense<0.000000e+00> : vector<8x128xf32>
    %67 = tpu.matmul %65, %66, %cst_43 {dimension_numbers = #tpu.dot_dimension_numbers<[1], [0], [0], [1], [0, 0, 1, 1], [], []>} : vector<8x128xbf16>, vector<128x128xbf16>, vector<8x128xf32> -> vector<8x128xf32>
    %c0_44 = arith.constant 0 : index
    %c0_45 = arith.constant 0 : index
    %68 = vector.load %arg13[%c0_44, %c0_45] : memref<1x128xf32, #tpu.memory_space<vmem>>, vector<1x128xf32>
    %69 = vector.broadcast %68 : vector<1x128xf32> to vector<8x128xf32>
    %70 = arith.addf %67, %69 : vector<8x128xf32>
    %cst_46 = arith.constant 0.000000e+00 : f32
    %71 = vector.broadcast %cst_46 : f32 to vector<8x128xf32>
    %72 = arith.maximumf %70, %71 : vector<8x128xf32>
    %73 = arith.truncf %72 : vector<8x128xf32> to vector<8x128xbf16>
    %c0_47 = arith.constant 0 : index
    %c0_48 = arith.constant 0 : index
    %74 = vector.load %arg16[%c0_47, %c0_48] : memref<128x128xbf16, #tpu.memory_space<vmem>>, vector<128x128xbf16>
    %cst_49 = arith.constant dense<0.000000e+00> : vector<8x128xf32>
    %75 = tpu.matmul %73, %74, %cst_49 {dimension_numbers = #tpu.dot_dimension_numbers<[1], [0], [0], [1], [0, 0, 1, 1], [], []>} : vector<8x128xbf16>, vector<128x128xbf16>, vector<8x128xf32> -> vector<8x128xf32>
    %c0_50 = arith.constant 0 : index
    %c0_51 = arith.constant 0 : index
    %76 = vector.load %arg17[%c0_50, %c0_51] : memref<1x128xf32, #tpu.memory_space<vmem>>, vector<1x128xf32>
    %77 = vector.broadcast %76 : vector<1x128xf32> to vector<8x128xf32>
    %78 = arith.addf %75, %77 : vector<8x128xf32>
    %c0_52 = arith.constant 0 : index
    %c0_53 = arith.constant 0 : index
    %79 = vector.load %arg20[%c0_52, %c0_53] : memref<8x128xf32, #tpu.memory_space<vmem>>, vector<8x128xf32>
    tpu.vector_store %arg20[%c0_52, %c0_53], %78 {strides = array<i32>} : memref<8x128xf32, #tpu.memory_space<vmem>>, vector<8x128xf32>,
    return
  }
  func.func @transform_0(%arg0: i32) -> (i32, i32) {
    %c0_i32 = arith.constant 0 : i32
    %c0_i32_0 = arith.constant 0 : i32
    return %arg0, %c0_i32 : i32, i32
  }
  func.func @transform_1(%arg0: i32) -> (i32, i32) {
    %c0_i32 = arith.constant 0 : i32
    %c0_i32_0 = arith.constant 0 : i32
    %c0_i32_1 = arith.constant 0 : i32
    return %c0_i32, %c0_i32_0 : i32, i32
  }
  func.func @transform_2(%arg0: i32) -> (i32, i32) {
    %c0_i32 = arith.constant 0 : i32
    %c0_i32_0 = arith.constant 0 : i32
    %c0_i32_1 = arith.constant 0 : i32
    return %c0_i32, %c0_i32_0 : i32, i32
  }
  func.func @transform_3(%arg0: i32) -> (i32, i32) {
    %c0_i32 = arith.constant 0 : i32
    %c0_i32_0 = arith.constant 0 : i32
    %c0_i32_1 = arith.constant 0 : i32
    return %c0_i32, %c0_i32_0 : i32, i32
  }
  func.func @transform_4(%arg0: i32) -> (i32, i32) {
    %c0_i32 = arith.constant 0 : i32
    %c0_i32_0 = arith.constant 0 : i32
    %c0_i32_1 = arith.constant 0 : i32
    return %c0_i32, %c0_i32_0 : i32, i32
  }
  func.func @transform_5(%arg0: i32) -> (i32, i32) {
    %c0_i32 = arith.constant 0 : i32
    %c0_i32_0 = arith.constant 0 : i32
    %c0_i32_1 = arith.constant 0 : i32
    return %c0_i32, %c0_i32_0 : i32, i32
  }
  func.func @transform_6(%arg0: i32) -> (i32, i32) {
    %c0_i32 = arith.constant 0 : i32
    %c0_i32_0 = arith.constant 0 : i32
    %c0_i32_1 = arith.constant 0 : i32
    return %c0_i32, %c0_i32_0 : i32, i32
  }
  func.func @transform_7(%arg0: i32) -> (i32, i32) {
    %c0_i32 = arith.constant 0 : i32
    %c0_i32_0 = arith.constant 0 : i32
    %c0_i32_1 = arith.constant 0 : i32
    return %c0_i32, %c0_i32_0 : i32, i32
  }
  func.func @transform_8(%arg0: i32) -> (i32, i32) {
    %c0_i32 = arith.constant 0 : i32
    %c0_i32_0 = arith.constant 0 : i32
    %c0_i32_1 = arith.constant 0 : i32
    return %c0_i32, %c0_i32_0 : i32, i32
  }
  func.func @transform_9(%arg0: i32) -> (i32, i32) {
    %c0_i32 = arith.constant 0 : i32
    %c0_i32_0 = arith.constant 0 : i32
    %c0_i32_1 = arith.constant 0 : i32
    return %c0_i32, %c0_i32_0 : i32, i32
  }
  func.func @transform_10(%arg0: i32) -> (i32, i32) {
    %c0_i32 = arith.constant 0 : i32
    %c0_i32_0 = arith.constant 0 : i32
    %c0_i32_1 = arith.constant 0 : i32
    return %c0_i32, %c0_i32_0 : i32, i32
  }
  func.func @transform_11(%arg0: i32) -> (i32, i32) {
    %c0_i32 = arith.constant 0 : i32
    %c0_i32_0 = arith.constant 0 : i32
    %c0_i32_1 = arith.constant 0 : i32
    return %c0_i32, %c0_i32_0 : i32, i32
  }
  func.func @transform_12(%arg0: i32) -> (i32, i32) {
    %c0_i32 = arith.constant 0 : i32
    %c0_i32_0 = arith.constant 0 : i32
    %c0_i32_1 = arith.constant 0 : i32
    return %c0_i32, %c0_i32_0 : i32, i32
  }
  func.func @transform_13(%arg0: i32) -> (i32, i32) {
    %c0_i32 = arith.constant 0 : i32
    %c0_i32_0 = arith.constant 0 : i32
    %c0_i32_1 = arith.constant 0 : i32
    return %c0_i32, %c0_i32_0 : i32, i32
  }
  func.func @transform_14(%arg0: i32) -> (i32, i32) {
    %c0_i32 = arith.constant 0 : i32
    %c0_i32_0 = arith.constant 0 : i32
    %c0_i32_1 = arith.constant 0 : i32
    return %c0_i32, %c0_i32_0 : i32, i32
  }
  func.func @transform_15(%arg0: i32) -> (i32, i32) {
    %c0_i32 = arith.constant 0 : i32
    %c0_i32_0 = arith.constant 0 : i32
    %c0_i32_1 = arith.constant 0 : i32
    return %c0_i32, %c0_i32_0 : i32, i32
  }
  func.func @transform_16(%arg0: i32) -> (i32, i32) {
    %c0_i32 = arith.constant 0 : i32
    %c0_i32_0 = arith.constant 0 : i32
    %c0_i32_1 = arith.constant 0 : i32
    return %c0_i32, %c0_i32_0 : i32, i32
  }
  func.func @transform_17(%arg0: i32) -> (i32, i32) {
    %c0_i32 = arith.constant 0 : i32
    %c0_i32_0 = arith.constant 0 : i32
    return %arg0, %c0_i32 : i32, i32
  }
  func.func @transform_18(%arg0: i32) -> (i32, i32) {
    %c0_i32 = arith.constant 0 : i32
    %c0_i32_0 = arith.constant 0 : i32
    return %arg0, %c0_i32 : i32, i32
  }
  func.func @transform_19(%arg0: i32) -> (i32, i32) {
    %c0_i32 = arith.constant 0 : i32
    %c0_i32_0 = arith.constant 0 : i32
    return %arg0, %c0_i32 : i32, i32
  }
}

</mosaic_0001>

<bundles_post_ra>
// kernel: idarec_forward.1
= control target key start
LH: loop header
LB: loop body
LE: loop exit
PB: predicated region body
PF: predicated region fallthrough
CT: control target
= control target key end

     0   :  { %s2195_s0 = inlined_call_operand.vmem [shape: f32[8,128], index: 0, kind: input, shape index: {}]   ;;  %s2196_s1 = inlined_call_operand.vmem [shape: bf16[128,16], index: 1, kind: input, shape index: {}]   ;;  %s2197_s2 = inlined_call_operand.hbm [shape: f32[1,16], index: 2, kind: input, shape index: {}]   ;;  %s2198_s3 = inlined_call_operand.vmem [shape: bf16[16,32], index: 3, kind: input, shape index: {}]   ;;  %s2199_s4 = inlined_call_operand.hbm [shape: f32[1,32], index: 4, kind: input, shape index: {}]   ;;  %s2200_s5 = inlined_call_operand.hbm [shape: bf16[32,384], index: 5, kind: input, shape index: {}]   ;;  %s2201_s6 = inlined_call_operand.hbm [shape: f32[1,384], index: 6, kind: input, shape index: {}]   ;;  %s2202_s7 = inlined_call_operand.vmem [shape: bf16[128,128], index: 7, kind: input, shape index: {}]   ;;  %s2203_s8 = inlined_call_operand.hbm [shape: f32[1,128], index: 8, kind: input, shape index: {}]   ;;  %s2204_s9 = inlined_call_operand.vmem [shape: bf16[128,128], index: 9, kind: input, shape index: {}]   ;;  %s2205_s10 = inlined_call_operand.hbm [shape: f32[1,128], index: 10, kind: input, shape index: {}]   ;;  %s2206_s11 = inlined_call_operand.hbm [shape: bf16[128,128], index: 11, kind: input, shape index: {}]   ;;  %s2207_s12 = inlined_call_operand.vmem [shape: f32[1,128], index: 12, kind: input, shape index: {}]   ;;  %s2208_s13 = inlined_call_operand.hbm [shape: bf16[128,128], index: 13, kind: input, shape index: {}]   ;;  %s2209_s14 = inlined_call_operand.hbm [shape: f32[1,128], index: 14, kind: input, shape index: {}]   ;;  %s2210_s15 = inlined_call_operand.hbm [shape: bf16[128,128], index: 15, kind: input, shape index: {}]   ;;  %s2211_s16 = inlined_call_operand.vmem [shape: f32[1,128], index: 16, kind: input, shape index: {}]   ;;  %s2212_s17 = inlined_call_operand.vmem [shape: f32[8,128], index: 17, kind: output, shape index: {0}]   ;;  %s2213_s18 = inlined_call_operand.hbm [shape: f32[8,128], index: 18, kind: output, shape index: {1}]   ;;  %s2214_s19 = inlined_call_operand.hbm [shape: f32[8,128], index: 19, kind: output, shape index: {2}]  }
   0x1   :  { %2217 = sst [smem:[#allocation30_spill]] %s2195_s0 }
   0x2   :  { %2218 = sst [smem:[#allocation31_spill]] %s2196_s1 }
   0x3   :  { %2219 = sst [smem:[#allocation32_spill]] %s2197_s2 }
   0x4   :  { %2220 = sst [smem:[#allocation33_spill]] %s2198_s3 }
   0x5   :  { %25 = vsyncpa [#allocation3], 0 }
   0x6   :  { %26 = vsyncpa [#allocation6], 0 }
   0x7   :  { %27 = vsyncpa [#allocation9], 0 }
   0x8   :  { %28 = vsyncpa [#allocation12], 0 }
   0x9   :  { %29 = vsyncpa [#allocation15], 0 }
   0xa   :  { %30 = vsyncpa [#allocation18], 0 }
   0xb   :  { %31 = vsyncpa [#allocation4], 0 }
   0xc   :  { %32 = vsyncpa [#allocation21], 0  ;;  %s1755_s0 = smov [#allocation5]   ;;  %s1756_s20 = smov [#allocation8]  }
   0xd   :  { %s55_s30 = sshll.u32 %s1755_s0, 4  ;;  %s77_s21 = sshll.u32 %s1756_s20, 4  ;;  %s56_s30 = int_to_ptr.vmem [resolvable:$true] %s55_s30  ;;  %s78_s21 = int_to_ptr.vmem [resolvable:$true] %s77_s21 }
   0xe   :  { %s1475_s2 = scalar_lea.hbm %s2199_s4, 16 }
   0xf   :  { %p1476_p0 = scmp.ne.s32.totalorder %s2199_s4, %s1475_s2  ;;  %p1479_p1 = scmp.lt.u32.totalorder %s1475_s2, %s2199_s4 }
  0x11   :  { %p1481_p2 = pnand %p1479_p1, %p1476_p0 }
  0x13   :  { %1484 = shalt.err (!%p1481_p2)
}
  0x14   :  { %s1485_s26 = scalar_lea.vmem %s56_s30, 16  ;;  %s1489_s27 = scalar_lea.vmem %s56_s30, 32 }
  0x15   :  { %p1486_p3 = scmp.ne.s32.totalorder %s56_s30, %s1485_s26  ;;  %p1490_p4 = scmp.lt.s32.totalorder %s56_s30, %s56_s30 }
  0x16   :  { %p1491_p5 = scmp.lt.s32.totalorder %s1489_s27, %s1485_s26 }
  0x18   :  { %p1492_p6 = por %p1491_p5, %p1490_p4 }
  0x1a   :  { %p1493_p7 = pnand %p1492_p6, %p1486_p3 }
  0x1c   :  { %1496 = shalt.err (!%p1493_p7)
}
  0x1d   :  { %58 = dma.hbm_to_vmem [thread:$0]  %s2199_s4, 16, %s56_s30, [#allocation6]  }
  0x1e   :  { %s1497_s1 = scalar_lea.hbm %s2201_s6, 48 }
  0x1f   :  { %p1498_p8 = scmp.ne.s32.totalorder %s2201_s6, %s1497_s1  ;;  %p1501_p9 = scmp.lt.u32.totalorder %s1497_s1, %s2201_s6 }
  0x21   :  { %p1503_p10 = pnand %p1501_p9, %p1498_p8 }
  0x23   :  { %1506 = shalt.err (!%p1503_p10)
}
  0x24   :  { %s1507_s25 = scalar_lea.vmem %s78_s21, 48  ;;  %s1511_s3 = scalar_lea.vmem %s78_s21, 64 }
  0x25   :  { %p1508_p11 = scmp.ne.s32.totalorder %s78_s21, %s1507_s25  ;;  %p1512_p12 = scmp.lt.s32.totalorder %s78_s21, %s78_s21 }
  0x26   :  { %p1513_p13 = scmp.lt.s32.totalorder %s1511_s3, %s1507_s25 }
  0x28   :  { %p1514_p0 = por %p1513_p13, %p1512_p12 }
  0x2a   :  { %p1515_p1 = pnand %p1514_p0, %p1508_p11 }
  0x2c   :  { %1518 = shalt.err (!%p1515_p1)
}
  0x2d   :  { %80 = dma.hbm_to_vmem [thread:$0]  %s2201_s6, 48, %s78_s21, [#allocation9]  }
  0x2e   :  { %s1757_s26 = smov [#allocation11]   ;;  %s1519_s0 = scalar_lea.hbm %s2205_s10, 16 }
  0x2f   :  { %s101_s27 = sshll.u32 %s1757_s26, 4  ;;  %p1520_p2 = scmp.ne.s32.totalorder %s2205_s10, %s1519_s0  ;;  %s102_s27 = int_to_ptr.vmem [resolvable:$true] %s101_s27 }
  0x30   :  { %p1523_p3 = scmp.lt.u32.totalorder %s1519_s0, %s2205_s10 }
  0x32   :  { %p1525_p4 = pnand %p1523_p3, %p1520_p2 }
  0x34   :  { %1528 = shalt.err (!%p1525_p4)
}
  0x35   :  { %s1529_s23 = scalar_lea.vmem %s102_s27, 16  ;;  %s1533_s6 = scalar_lea.vmem %s102_s27, 32 }
  0x36   :  { %p1530_p5 = scmp.ne.s32.totalorder %s102_s27, %s1529_s23  ;;  %p1534_p6 = scmp.lt.s32.totalorder %s102_s27, %s102_s27 }
  0x37   :  { %p1535_p7 = scmp.lt.s32.totalorder %s1533_s6, %s1529_s23 }
  0x39   :  { %p1536_p8 = por %p1535_p7, %p1534_p6 }
  0x3b   :  { %p1537_p9 = pnand %p1536_p8, %p1530_p5 }
  0x3d   :  { %1540 = shalt.err (!%p1537_p9)
}
  0x3e   :  { %104 = dma.hbm_to_vmem [thread:$0]  %s2205_s10, 16, %s102_s27, [#allocation12]  }
  0x3f   :  { %s1758_s25 = smov [#allocation14]   ;;  %s1759_s4 = smov [#allocation2]  }
  0x40   :  { %s124_s3 = sshll.u32 %s1758_s25, 4  ;;  %s43_s30 = sshll.u32 %s1759_s4, 4  ;;  %s125_s3 = int_to_ptr.vmem [resolvable:$true] %s124_s3  ;;  %s44_s30 = int_to_ptr.vmem [resolvable:$true] %s43_s30 }
  0x41   :  { %s1541_s29 = scalar_lea.hbm %s2208_s13, 1024 }
  0x42   :  { %p1542_p10 = scmp.ne.s32.totalorder %s2208_s13, %s1541_s29  ;;  %p1545_p11 = scmp.lt.u32.totalorder %s1541_s29, %s2208_s13 }
  0x44   :  { %p1547_p12 = pnand %p1545_p11, %p1542_p10 }
  0x46   :  { %1550 = shalt.err (!%p1547_p12)
}
  0x47   :  { %s1551_s10 = scalar_lea.vmem %s125_s3, 1024  ;;  %p1556_p0 = scmp.lt.s32.totalorder %s125_s3, %s125_s3 }
  0x48   :  { %p1552_p13 = scmp.ne.s32.totalorder %s125_s3, %s1551_s10  ;;  %p1557_p1 = scmp.lt.s32.totalorder %s1551_s10, %s1551_s10 }
  0x4a   :  { %p1558_p2 = por %p1557_p1, %p1556_p0 }
  0x4c   :  { %p1559_p3 = pnand %p1558_p2, %p1552_p13 }
  0x4e   :  { %1562 = shalt.err (!%p1559_p3)
}
  0x4f   :  { %s1760_s27 = smov 64   ;;  %s1761_s2 = smov 4  }
  0x50   :  { %130 = dma.hbm_to_vmem [thread:$0]  %s2208_s13, 1024, %s125_s3, [#allocation15], %s1760_s27, %s1760_s27, %s1761_s2  }
  0x51   :  { %s2221_s25 = sld [smem:[#allocation32_spill]] }
  0x57   :  { %s1563_s4 = scalar_lea.hbm %s2221_s25, 16 }
  0x58   :  { %p1564_p4 = scmp.ne.s32.totalorder %s2221_s25, %s1563_s4  ;;  %p1567_p5 = scmp.lt.u32.totalorder %s1563_s4, %s2221_s25 }
  0x5a   :  { %p1569_p6 = pnand %p1567_p5, %p1564_p4 }
  0x5c   :  { %1572 = shalt.err (!%p1569_p6)
}
  0x5d   :  { %s1573_s20 = scalar_lea.vmem %s44_s30, 16  ;;  %s1577_s1 = scalar_lea.vmem %s44_s30, 32 }
  0x5e   :  { %p1574_p7 = scmp.ne.s32.totalorder %s44_s30, %s1573_s20  ;;  %p1578_p8 = scmp.lt.s32.totalorder %s44_s30, %s44_s30 }
  0x5f   :  { %p1579_p9 = scmp.lt.s32.totalorder %s1577_s1, %s1573_s20 }
  0x61   :  { %p1580_p10 = por %p1579_p9, %p1578_p8 }
  0x63   :  { %p1581_p11 = pnand %p1580_p10, %p1574_p7 }
  0x65   :  { %1584 = shalt.err (!%p1581_p11)
}
  0x66   :  { %46 = dma.hbm_to_vmem [thread:$0]  %s2221_s25, 16, %s44_s30, [#allocation3]  }
  0x67   :  { %s1762_s22 = smov [#allocation7]   ;;  %s1585_s21 = scalar_lea.hbm %s2200_s5, 768 }
  0x68   :  { %s64_s10 = sshll.u32 %s1762_s22, 4  ;;  %p1586_p12 = scmp.ne.s32.totalorder %s2200_s5, %s1585_s21  ;;  %s65_s10 = int_to_ptr.vmem [resolvable:$true] %s64_s10 }
  0x69   :  { %p1589_p13 = scmp.lt.u32.totalorder %s1585_s21, %s2200_s5 }
  0x6b   :  { %p1591_p0 = pnand %p1589_p13, %p1586_p12 }
  0x6d   :  { %1594 = shalt.err (!%p1591_p0)
}
  0x6e   :  { %s1595_s29 = scalar_lea.vmem %s65_s10, 768  ;;  %p1600_p2 = scmp.lt.s32.totalorder %s65_s10, %s65_s10 }
  0x6f   :  { %p1596_p1 = scmp.ne.s32.totalorder %s65_s10, %s1595_s29  ;;  %p1601_p3 = scmp.lt.s32.totalorder %s1595_s29, %s1595_s29 }
  0x71   :  { %p1602_p4 = por %p1601_p3, %p1600_p2 }
  0x73   :  { %p1603_p5 = pnand %p1602_p4, %p1596_p1 }
  0x75   :  { %1606 = shalt.err (!%p1603_p5)
}
  0x76   :  { %s1763_s30 = smov 192   ;;  %s1764_s25 = smov 12  }
  0x77   :  { %70 = dma.hbm_to_vmem [thread:$0]  %s2200_s5, 768, %s65_s10, [#allocation6], %s1763_s30, %s1763_s30, %s1764_s25  }
  0x78   :  { %s1765_s1 = smov [#allocation10]   ;;  %s1766_s3 = smov [#allocation13]  }
  0x79   :  { %s89_s13 = sshll.u32 %s1765_s1, 4  ;;  %s110_s22 = sshll.u32 %s1766_s3, 4  ;;  %s90_s13 = int_to_ptr.vmem [resolvable:$true] %s89_s13  ;;  %s1949_s22 = int_to_ptr.vmem [resolvable:$true] %s110_s22 }
  0x7a   :  { %s1607_s21 = scalar_lea.hbm %s2203_s8, 16 }
  0x7b   :  { %p1608_p6 = scmp.ne.s32.totalorder %s2203_s8, %s1607_s21  ;;  %p1611_p7 = scmp.lt.u32.totalorder %s1607_s21, %s2203_s8 }
  0x7d   :  { %p1613_p8 = pnand %p1611_p7, %p1608_p6 }
  0x7f   :  { %1616 = shalt.err (!%p1613_p8)
}
  0x80   :  { %s1617_s5 = scalar_lea.vmem %s90_s13, 16  ;;  %s1621_s10 = scalar_lea.vmem %s90_s13, 32 }
  0x81   :  { %p1618_p9 = scmp.ne.s32.totalorder %s90_s13, %s1617_s5  ;;  %p1622_p10 = scmp.lt.s32.totalorder %s90_s13, %s90_s13 }
  0x82   :  { %p1623_p11 = scmp.lt.s32.totalorder %s1621_s10, %s1617_s5 }
  0x84   :  { %p1624_p12 = por %p1623_p11, %p1622_p10 }
  0x86   :  { %p1625_p13 = pnand %p1624_p12, %p1618_p9 }
  0x88   :  { %1628 = shalt.err (!%p1625_p13)
}
  0x89   :  { %92 = dma.hbm_to_vmem [thread:$0]  %s2203_s8, 16, %s90_s13, [#allocation9]  }
  0x8a   :  { %s1629_s20 = scalar_lea.hbm %s2206_s11, 1024 }
  0x8b   :  { %p1630_p0 = scmp.ne.s32.totalorder %s2206_s11, %s1629_s20  ;;  %p1633_p1 = scmp.lt.u32.totalorder %s1629_s20, %s2206_s11 }
  0x8d   :  { %p1635_p2 = pnand %p1633_p1, %p1630_p0 }
  0x8f   :  { %1638 = shalt.err (!%p1635_p2)
}
  0x90   :  { %s1639_s21 = scalar_lea.vmem %s1949_s22, 1024  ;;  %p1644_p4 = scmp.lt.s32.totalorder %s1949_s22, %s1949_s22 }
  0x91   :  { %p1640_p3 = scmp.ne.s32.totalorder %s1949_s22, %s1639_s21  ;;  %p1645_p5 = scmp.lt.s32.totalorder %s1639_s21, %s1639_s21 }
  0x93   :  { %p1646_p6 = por %p1645_p5, %p1644_p4 }
  0x95   :  { %p1647_p7 = pnand %p1646_p6, %p1640_p3 }
  0x97   :  { %1650 = shalt.err (!%p1647_p7)
}
  0x98   :  { %116 = dma.hbm_to_vmem [thread:$0]  %s2206_s11, 1024, %s1949_s22, [#allocation12], %s1760_s27, %s1760_s27, %s1761_s2  }
  0x99   :  { %s1767_s24 = smov [#allocation16]   ;;  %s1768_s26 = smov [#allocation17]  }
  0x9a   :  { %s137_s4 = sshll.u32 %s1767_s24, 4  ;;  %s146_s28 = sshll.u32 %s1768_s26, 4  ;;  %s138_s4 = int_to_ptr.vmem [resolvable:$true] %s137_s4  ;;  %s1983_s28 = int_to_ptr.vmem [resolvable:$true] %s146_s28 }
  0x9b   :  { %s1651_s29 = scalar_lea.hbm %s2209_s14, 16 }
  0x9c   :  { %p1652_p8 = scmp.ne.s32.totalorder %s2209_s14, %s1651_s29  ;;  %p1655_p9 = scmp.lt.u32.totalorder %s1651_s29, %s2209_s14 }
  0x9e   :  { %p1657_p10 = pnand %p1655_p9, %p1652_p8 }
  0xa0   :  { %1660 = shalt.err (!%p1657_p10)
}
  0xa1   :  { %s1661_s11 = scalar_lea.vmem %s138_s4, 16  ;;  %s1665_s22 = scalar_lea.vmem %s138_s4, 32 }
  0xa2   :  { %p1662_p11 = scmp.ne.s32.totalorder %s138_s4, %s1661_s11  ;;  %p1666_p12 = scmp.lt.s32.totalorder %s138_s4, %s138_s4 }
  0xa3   :  { %p1667_p13 = scmp.lt.s32.totalorder %s1665_s22, %s1661_s11 }
  0xa5   :  { %p1668_p0 = por %p1667_p13, %p1666_p12 }
  0xa7   :  { %p1669_p1 = pnand %p1668_p0, %p1662_p11 }
  0xa9   :  { %1672 = shalt.err (!%p1669_p1)
}
  0xaa   :  { %140 = dma.hbm_to_vmem [thread:$0]  %s2209_s14, 16, %s138_s4, [#allocation15]  }
  0xab   :  { %s1673_s21 = scalar_lea.hbm %s2210_s15, 1024 }
  0xac   :  { %p1674_p2 = scmp.ne.s32.totalorder %s2210_s15, %s1673_s21  ;;  %p1677_p3 = scmp.lt.u32.totalorder %s1673_s21, %s2210_s15 }
  0xae   :  { %p1679_p4 = pnand %p1677_p3, %p1674_p2 }
  0xb0   :  { %1682 = shalt.err (!%p1679_p4)
}
  0xb1   :  { %s1683_s5 = scalar_lea.vmem %s1983_s28, 1024  ;;  %p1688_p6 = scmp.lt.s32.totalorder %s1983_s28, %s1983_s28 }
  0xb2   :  { %p1684_p5 = scmp.ne.s32.totalorder %s1983_s28, %s1683_s5  ;;  %p1689_p7 = scmp.lt.s32.totalorder %s1683_s5, %s1683_s5 }
  0xb4   :  { %p1690_p8 = por %p1689_p7, %p1688_p6 }
  0xb6   :  { %p1691_p9 = pnand %p1690_p8, %p1684_p5 }
  0xb8   :  { %1694 = shalt.err (!%p1691_p9)
}
  0xb9   :  { %152 = dma.hbm_to_vmem [thread:$0]  %s2210_s15, 1024, %s1983_s28, [#allocation18], %s1760_s27, %s1760_s27, %s1761_s2  }
  0xba   :  { %1739 = dma.done.wait [#allocation3], 16  }
  0xbb   :  { %1740 = vsyncadd [#allocation3], 4294967280 }
  0xbc   :  { %1741 = dma.done.wait [#allocation6], 784  }
  0xbd   :  { %1742 = vsyncadd [#allocation6], 4294966512 }
  0xbe   :  { %1743 = dma.done.wait [#allocation9], 64  }
  0xbf   :  { %1744 = vsyncadd [#allocation9], 4294967232 }
  0xc0   :  { %1745 = dma.done.wait [#allocation12], 1040  }
  0xc1   :  { %1746 = vsyncadd [#allocation12], 4294966256 }
  0xc2   :  { %1747 = dma.done.wait [#allocation15], 1040  }
  0xc3   :  { %1748 = vsyncadd [#allocation15], 4294966256 }
  0xc4   :  { %1749 = dma.done.wait [#allocation18], 1024  }
  0xc5   :  { %1750 = vsyncadd [#allocation18], 4294966272  ;;  %v1769_v0 = vmov 0.0   ;;  %vm1770_vm0 = vmmov 0   ;;  %s2222_s2 = sld [smem:[#allocation31_spill]]  ;;  %s2223_s24 = sld [smem:[#allocation30_spill]]  ;;  %v377_v54 = vlaneseq }
  0xc6   :  { %1253 = vmatprep.subr.bf16.mxu0 %v1769_v0  ;;  %1269 = vmatprep.mubr.msk.bf16.mxu0 %vm1770_vm0, %v1769_v0  ;;  %s2224_s14 = sld [smem:[#allocation33_spill]]  ;;  %v1415_v12 = vld [vmem:[#allocation7] ss:$12 sps:$4 sm:$0xff]   ;;  %v1417_v13 = vld [vmem:[#allocation7 + $0x4] ss:$12 sps:$4 sm:$0xff]   ;;  %vm321_vm1 = vcmask 130048  }
  0xc7   :  { %1273 = vmatprep.subr.bf16.mxu1 %v1769_v0  ;;  %1275 = vmatprep.mubr.msk.bf16.mxu1 %vm1770_vm0, %v1769_v0  ;;  %v1126_v14 = vld [vmem:[#allocation2] ss:$0 sm:$0xff]  ;;  %v1418_v25 = vld [vmem:[#allocation7 + $0x8] ss:$12 sps:$4 sm:$0xff]   ;;  %v1419_v27 = vld [vmem:[#allocation7 + $0x18] ss:$12 sps:$4 sm:$0xff]  }
  0xc8   :  { %v1421_v26 = vld [vmem:[#allocation7 + $0x1c] ss:$12 sps:$4 sm:$0xff]   ;;  %v1422_v28 = vld [vmem:[#allocation7 + $0x20] ss:$12 sps:$4 sm:$0xff]   ;;  %v1771_v29 = vmov 0   ;;  %vm424_vm2 = vcmask 261120  }
  0xc9   :  { %v1136_v30 = vld [vmem:[#allocation5] ss:$0 sm:$0xff]  ;;  %v1424_v39 = vld [vmem:[%s2204_s9 + $0x8] sm:$0xff]   ;;  %v1425_v40 = vld [vmem:[%s2204_s9 + $0x10] sm:$0xff]   ;;  %v378_v55 = vshrl.u32 %v377_v54, 7 }
  0xca   :  { %v1423_v37 = vld [vmem:[%s2204_s9] sm:$0xff]   ;;  %v1426_v41 = vld [vmem:[%s2204_s9 + $0x18] sm:$0xff]   ;;  %v1428_v43 = vld [vmem:[%s2204_s9 + $0x28] sm:$0xff]  }
  0xcb   :  { %v1406_v1 = vld [vmem:[%s2222_s2] sm:$0xff]   ;;  %v1407_v2 = vld [vmem:[%s2222_s2 + $0x8] sm:$0xff]   ;;  %v1408_v3 = vld [vmem:[%s2222_s2 + $0x10] sm:$0xff]   ;;  %v379_v56 = vsub.s32 0, %v378_v55  ;;  %v383_v58 = vsub.s32 1, %v378_v55 }
  0xcc   :  { %1254 = vmatpush3.bf16.msra.mxu0 %v1406_v1  ;;  %v1409_v4 = vld [vmem:[%s2222_s2 + $0x18] sm:$0xff]   ;;  %v1410_v5 = vld [vmem:[%s2222_s2 + $0x20] sm:$0xff]   ;;  %v1411_v6 = vld [vmem:[%s2222_s2 + $0x28] sm:$0xff]  }
  0xcd   :  { %1255 = vmatprep.subr.bf16.mxu0 %v1769_v0  ;;  %v1412_v7 = vld [vmem:[%s2222_s2 + $0x30] sm:$0xff]   ;;  %v1413_v8 = vld [vmem:[%s2222_s2 + $0x38] sm:$0xff]   ;;  %v186_v9 = vld [vmem:[%s2223_s24] sm:$0xff] }
  0xce   :  { %v187_v10 = vpack.c.bf16 %v186_v9, %v186_v9  ;;  %v1414_v11 = vld [vmem:[%s2224_s14] sm:$0xff]   ;;  %v1430_v45 = vld [vmem:[%s2204_s9 + $0x30] sm:$0xff]   ;;  %v1431_v46 = vld [vmem:[%s2202_s7 + $0x8] sm:$0xff]  }
  0xcf   :  { %1274 = vmatpush3.bf16.msra.mxu1 %v1414_v11  ;;  %v1427_v42 = vld [vmem:[%s2204_s9 + $0x20] sm:$0xff]   ;;  %v1432_v47 = vld [vmem:[%s2204_s9 + $0x38] sm:$0xff]   ;;  %v1433_v48 = vld [vmem:[%s2202_s7 + $0x10] sm:$0xff]  }
  0xd0   :  { %1256 = vmatpush3.bf16.msra.mxu0 %v1407_v2  ;;  %1279 = vmatprep.subr.bf16.mxu1 %v1769_v0  ;;  %v1429_v44 = vld [vmem:[%s2202_s7] sm:$0xff]   ;;  %v1435_v49 = vld [vmem:[%s2202_s7 + $0x18] sm:$0xff]   ;;  %v1439_v51 = vld [vmem:[%s2202_s7 + $0x28] sm:$0xff]  }
  0xd1   :  { %1257 = vmatprep.subr.bf16.mxu0 %v1769_v0  ;;  %v1437_v50 = vld [vmem:[%s2202_s7 + $0x20] sm:$0xff]   ;;  %v1441_v52 = vld [vmem:[%s2202_s7 + $0x30] sm:$0xff]   ;;  %v1443_v53 = vld [vmem:[%s2202_s7 + $0x38] sm:$0xff]  }
  0xd2   :  { %v375_v57 = vld [vmem:[#allocation8] sm:$0x7] }
  0xd3   :  { %v380_v59 = vrot.slane %v375_v57, %v379_v56  ;;  %v384_v60 = vrot.slane %v375_v57, %v383_v58  ;;  %v1176_v58 = vld [vmem:[%s2207_s12] ss:$0 sm:$0xff]  ;;  %s1772_s12 = smov [#allocation19]  }
  0xd4   :  { %1258 = vmatpush3.bf16.msra.mxu0 %v1408_v3  ;;  %s1096_s20 = sshll.u32 %s1772_s12, 4  ;;  %s1097_s20 = int_to_ptr.vmem [resolvable:$true] %s1096_s20 }
  0xd5   :  { %1259 = vmatprep.subr.bf16.mxu0 %v1769_v0  ;;  %s1695_s11 = scalar_lea.vmem %s1097_s20, 128  ;;  %p1700_p11 = scmp.lt.s32.totalorder %s1097_s20, %s1097_s20 }
  0xd6   :  { %p1696_p10 = scmp.ne.s32.totalorder %s1097_s20, %s1695_s11  ;;  %p1701_p12 = scmp.lt.s32.totalorder %s1695_s11, %s1695_s11 }
  0xd8   :  { %1260 = vmatpush3.bf16.msra.mxu0 %v1409_v4  ;;  %p1702_p13 = por %p1701_p12, %p1700_p11 }
  0xd9   :  { %1261 = vmatprep.subr.bf16.mxu0 %v1769_v0 }
  0xda   :  { %p1703_p0 = pnand %p1702_p13, %p1696_p10 }
  0xdc   :  { %1262 = vmatpush3.bf16.msra.mxu0 %v1410_v5 }
  0xdd   :  { %1263 = vmatprep.subr.bf16.mxu0 %v1769_v0 }
  0xe0   :  { %1264 = vmatpush3.bf16.msra.mxu0 %v1411_v6 }
  0xe1   :  { %1265 = vmatprep.subr.bf16.mxu0 %v1769_v0 }
  0xe4   :  { %1266 = vmatpush3.bf16.msra.mxu0 %v1412_v7 }
  0xe5   :  { %1267 = vmatprep.subr.bf16.mxu0 %v1769_v0 }
  0xe8   :  { %1268 = vmatpush3.bf16.msra.mxu0 %v1413_v8 }
  0xe9   :  { %428 = vmatprep.subr.bf16.mxu0 %v1417_v13  ;;  %v1438_v13 = vld [vmem:[#allocation13 + $0x10] sm:$0xff]  }
  0xeb   :  { %1270 = vmatmul.mubr.bf16.vlgmr.msra.gmra.mrb[0].mxu0 %v187_v10  ;;  %v1434_v10 = vld [vmem:[#allocation13] sm:$0xff]  }
  0xec   :  { %429 = vmatpush1.bf16.msra.mxu0 %v1415_v12  ;;  %460 = vmatprep.mubr.bf16.mxu0 %v1771_v29  ;;  %v1436_v12 = vld [vmem:[#allocation13 + $0x8] sm:$0xff]   ;;  %v1449_v29 = vld [vmem:[#allocation14 + $0x10] sm:$0xff]  }
  0xed   :  { %430 = vmatprep.subr.bf16.mxu0 %v1421_v26  ;;  %v1448_v26 = vld [vmem:[#allocation14 + $0x8] sm:$0xff]  }
  0xf0   :  { %431 = vmatpush1.bf16.msra.mxu0 %v1419_v27  ;;  %v1446_v27 = vld [vmem:[#allocation13 + $0x38] sm:$0xff]  }
  0xf1   :  { %1307 = vmatprep.subr.bf16.mxu0 %v1769_v0 }
 0x1be   :  { %v293_v15 = vpop.f32.mrb[0].mxu0 }
 0x1bf   :  { %v294_v16 = vadd.f32 %v1126_v14, %v293_v15  ;;  %v1271_v17 = vpop.f32.mrb[1].mxu0 }
 0x1c0   :  { %v296_v18 = vpop.f32.mrb[2].mxu0  ;;  %v1442_v17 = vld [vmem:[#allocation13 + $0x20] sm:$0xff]  }
 0x1c1   :  { %v1135_v19 = vmul.f32 -1.442695, %v294_v16  ;;  %v1272_v20 = vpop.f32.mrb[3].mxu0  ;;  %v1440_v16 = vld [vmem:[#allocation13 + $0x18] sm:$0xff]   ;;  %v387_v18 = vsub.s32 2, %v378_v55 }
 0x1c3   :  { %1463 = vpow2.f32 %v1135_v19  ;;  %v1444_v19 = vld [vmem:[#allocation13 + $0x28] sm:$0xff]   ;;  %v388_v20 = vrot.slane %v375_v57, %v387_v18  ;;  %v1461_v57 = vld [vmem:[#allocation17 + $0x30] sm:$0xff]  }
 0x1cd   :  { %v1464_v21 = vpop.eup %1463 }
 0x1ce   :  { %v302_v22 = vadd.f32 1.0, %v1464_v21 }
 0x1d0   :  { %1465 = vrcp.f32 %v302_v22  ;;  %v1447_v22 = vld [vmem:[#allocation14] sm:$0xff]  }
 0x1da   :  { %v1466_v23 = vpop.eup %1465 }
 0x1db   :  { %v305_v24 = vpack.c.bf16 %v1466_v23, %v1466_v23 }
 0x1dd   :  { %1276 = vmatmul.mubr.msk.bf16.vlgmr.msra.gmra.mrb[0].mxu1 %vm321_vm1, %v305_v24  ;;  %v1445_v24 = vld [vmem:[#allocation13 + $0x30] sm:$0xff]  }
 0x1de   :  { %1283 = vmatprep.mubr.msk.bf16.mxu1 %vm1770_vm0, %v1769_v0  ;;  %1280 = vmatpush3.bf16.msra.mxu1 %v1418_v25 }
 0x1df   :  { %1281 = vmatprep.subr.bf16.mxu1 %v1769_v0 }
 0x1e2   :  { %1282 = vmatpush3.bf16.msra.mxu1 %v1422_v28 }
 0x1e3   :  { %1287 = vmatprep.subr.bf16.mxu1 %v1769_v0 }
 0x2b0   :  { %v359_v31 = vpop.f32.mrb[0].mxu1 }
 0x2b1   :  { %v360_v32 = vadd.f32 %v1136_v30, %v359_v31  ;;  %v1277_v33 = vpop.f32.mrb[1].mxu1  ;;  %v1450_v31 = vld [vmem:[#allocation14 + $0x18] sm:$0xff]  }
 0x2b2   :  { %v362_v34 = vpop.f32.mrb[2].mxu1  ;;  %v1452_v33 = vld [vmem:[#allocation14 + $0x28] sm:$0xff]  }
 0x2b3   :  { %v365_v35 = vmax.f32 %v360_v32, 0.0  ;;  %v1278_v36 = vpop.f32.mrb[3].mxu1  ;;  %v1451_v32 = vld [vmem:[#allocation14 + $0x20] sm:$0xff]   ;;  %v1453_v34 = vld [vmem:[#allocation14 + $0x30] sm:$0xff]  }
 0x2b4   :  { %v1158_v36 = vld [vmem:[#allocation11] ss:$0 sm:$0xff] }
 0x2b5   :  { %v366_v38 = vpack.c.bf16 %v365_v35, %v365_v35  ;;  %v1454_v35 = vld [vmem:[#allocation14 + $0x38] sm:$0xff]  }
 0x2b7   :  { %1145 = vmatmul.mubr.msk.bf16.vlgmr.msra.gmra.mrb[4].mxu0 %vm424_vm2, %v366_v38  ;;  %1284 = vmatmul.mubr.msk.bf16.vlgmr.msra.gmra.mrb[4].mxu1 %vm424_vm2, %v366_v38 }
 0x2b8   :  { %1308 = vmatpush3.bf16.msra.mxu0 %v1423_v37  ;;  %1323 = vmatprep.mubr.msk.bf16.mxu0 %vm1770_vm0, %v1769_v0 }
 0x2b9   :  { %1309 = vmatprep.subr.bf16.mxu0 %v1769_v0  ;;  %1303 = vmatprep.mubr.msk.bf16.mxu1 %vm1770_vm0, %v1769_v0 }
 0x2ba   :  { %1288 = vmatpush3.bf16.msra.mxu1 %v1429_v44 }
 0x2bb   :  { %1289 = vmatprep.subr.bf16.mxu1 %v1769_v0 }
 0x2bc   :  { %1310 = vmatpush3.bf16.msra.mxu0 %v1424_v39 }
 0x2bd   :  { %1311 = vmatprep.subr.bf16.mxu0 %v1769_v0 }
 0x2be   :  { %1290 = vmatpush3.bf16.msra.mxu1 %v1431_v46  ;;  %v1457_v46 = vld [vmem:[#allocation17 + $0x10] sm:$0xff]  }
 0x2bf   :  { %1291 = vmatprep.subr.bf16.mxu1 %v1769_v0 }
 0x2c0   :  { %1312 = vmatpush3.bf16.msra.mxu0 %v1425_v40 }
 0x2c1   :  { %1313 = vmatprep.subr.bf16.mxu0 %v1769_v0 }
 0x2c2   :  { %1292 = vmatpush3.bf16.msra.mxu1 %v1433_v48  ;;  %v1459_v48 = vld [vmem:[#allocation17 + $0x20] sm:$0xff]  }
 0x2c3   :  { %1293 = vmatprep.subr.bf16.mxu1 %v1769_v0 }
 0x2c4   :  { %1314 = vmatpush3.bf16.msra.mxu0 %v1426_v41 }
 0x2c5   :  { %1315 = vmatprep.subr.bf16.mxu0 %v1769_v0 }
 0x2c6   :  { %1294 = vmatpush3.bf16.msra.mxu1 %v1435_v49  ;;  %v1148_v49 = vld [vmem:[#allocation10] ss:$0 sm:$0xff] }
 0x2c7   :  { %1295 = vmatprep.subr.bf16.mxu1 %v1769_v0 }
 0x2c8   :  { %1316 = vmatpush3.bf16.msra.mxu0 %v1427_v42 }
 0x2c9   :  { %1317 = vmatprep.subr.bf16.mxu0 %v1769_v0 }
 0x2ca   :  { %1296 = vmatpush3.bf16.msra.mxu1 %v1437_v50 }
 0x2cb   :  { %1297 = vmatprep.subr.bf16.mxu1 %v1769_v0 }
 0x2cc   :  { %1318 = vmatpush3.bf16.msra.mxu0 %v1428_v43  ;;  %v1455_v43 = vld [vmem:[#allocation17] sm:$0xff]  }
 0x2cd   :  { %1319 = vmatprep.subr.bf16.mxu0 %v1769_v0 }
 0x2ce   :  { %1298 = vmatpush3.bf16.msra.mxu1 %v1439_v51 }
 0x2cf   :  { %1299 = vmatprep.subr.bf16.mxu1 %v1769_v0 }
 0x2d0   :  { %1320 = vmatpush3.bf16.msra.mxu0 %v1430_v45  ;;  %v1456_v45 = vld [vmem:[#allocation17 + $0x8] sm:$0xff]  }
 0x2d1   :  { %1321 = vmatprep.subr.bf16.mxu0 %v1769_v0 }
 0x2d2   :  { %1300 = vmatpush3.bf16.msra.mxu1 %v1441_v52 }
 0x2d3   :  { %1301 = vmatprep.subr.bf16.mxu1 %v1769_v0 }
 0x2d4   :  { %1322 = vmatpush3.bf16.msra.mxu0 %v1432_v47  ;;  %v1458_v47 = vld [vmem:[#allocation17 + $0x18] sm:$0xff]  }
 0x2d5   :  { %1347 = vmatprep.subr.bf16.mxu0 %v1769_v0 }
 0x2d6   :  { %1302 = vmatpush3.bf16.msra.mxu1 %v1443_v53  ;;  %v1460_v53 = vld [vmem:[#allocation17 + $0x28] sm:$0xff]  }
 0x2d7   :  { %1327 = vmatprep.subr.bf16.mxu1 %v1769_v0 }
 0x38a   :  { %v462_v61 = vpop.f32.mrb[4].mxu0  ;;  %v503_v62 = vpop.f32.mrb[4].mxu1 }
 0x38b   :  { %v463_v63 = vadd.f32 %v462_v61, %v380_v59  ;;  %v464_v1 = vpop.f32.mrb[5].mxu0  ;;  %v1285_v2 = vpop.f32.mrb[5].mxu1  ;;  %v504_v25 = vadd.f32 %v503_v62, %v388_v20 }
 0x38c   :  { %v465_v3 = vadd.f32 %v464_v1, %v384_v60  ;;  %v466_v4 = vpop.f32.mrb[6].mxu0  ;;  %v506_v5 = vpop.f32.mrb[6].mxu1  ;;  %v1462_v60 = vld [vmem:[#allocation17 + $0x38] sm:$0xff]  }
 0x38d   :  { %v1147_v6 = vmul.f32 -1.442695, %v463_v63  ;;  %v467_v7 = vpop.f32.mrb[7].mxu0  ;;  %v1286_v8 = vpop.f32.mrb[7].mxu1  ;;  %v516_v28 = vmax.f32 %v504_v25, 0.0 }
 0x38e   :  { %v515_v9 = vmax.f32 %v465_v3, 0.0  ;;  %v1167_v7 = vld [vmem:[#allocation16] ss:$0 sm:$0xff] }
 0x38f   :  { %1467 = vpow2.f32 %v1147_v6  ;;  %v862_v30 = vpack.c.bf16 %v516_v28, %v516_v28 }
 0x390   :  { %v636_v11 = vpack.c.bf16 %v515_v9, %v515_v9 }
 0x392   :  { %1324 = vmatmul.mubr.bf16.vlgmr.msra.gmra.mrb[8].mxu0 %v636_v11 }
 0x393   :  { %1348 = vmatpush3.bf16.msra.mxu0 %v1434_v10  ;;  %1363 = vmatprep.mubr.msk.bf16.mxu0 %vm1770_vm0, %v1769_v0 }
 0x394   :  { %1349 = vmatprep.subr.bf16.mxu0 %v1769_v0 }
 0x397   :  { %1350 = vmatpush3.bf16.msra.mxu0 %v1436_v12 }
 0x398   :  { %1351 = vmatprep.subr.bf16.mxu0 %v1769_v0 }
 0x399   :  { %v1468_v14 = vpop.eup %1467 }
 0x39a   :  { %v512_v15 = vadd.f32 1.0, %v1468_v14 }
 0x39b   :  { %1352 = vmatpush3.bf16.msra.mxu0 %v1438_v13 }
 0x39c   :  { %1469 = vrcp.f32 %v512_v15  ;;  %1353 = vmatprep.subr.bf16.mxu0 %v1769_v0 }
 0x39f   :  { %1354 = vmatpush3.bf16.msra.mxu0 %v1440_v16 }
 0x3a0   :  { %1355 = vmatprep.subr.bf16.mxu0 %v1769_v0 }
 0x3a3   :  { %1356 = vmatpush3.bf16.msra.mxu0 %v1442_v17 }
 0x3a4   :  { %1357 = vmatprep.subr.bf16.mxu0 %v1769_v0 }
 0x3a6   :  { %v1470_v21 = vpop.eup %1469 }
 0x3a7   :  { %1358 = vmatpush3.bf16.msra.mxu0 %v1444_v19  ;;  %v517_v23 = vpack.c.bf16 %v1470_v21, %v1470_v21 }
 0x3a8   :  { %1359 = vmatprep.subr.bf16.mxu0 %v1769_v0 }
 0x3a9   :  { %1304 = vmatmul.mubr.bf16.vlgmr.msra.gmra.mrb[8].mxu1 %v517_v23 }
 0x3aa   :  { %1328 = vmatpush3.bf16.msra.mxu1 %v1447_v22  ;;  %1343 = vmatprep.mubr.msk.bf16.mxu1 %vm1770_vm0, %v1769_v0 }
 0x3ab   :  { %1360 = vmatpush3.bf16.msra.mxu0 %v1445_v24  ;;  %1329 = vmatprep.subr.bf16.mxu1 %v1769_v0 }
 0x3ac   :  { %1361 = vmatprep.subr.bf16.mxu0 %v1769_v0 }
 0x3ae   :  { %1330 = vmatpush3.bf16.msra.mxu1 %v1448_v26 }
 0x3af   :  { %1362 = vmatpush3.bf16.msra.mxu0 %v1446_v27  ;;  %1331 = vmatprep.subr.bf16.mxu1 %v1769_v0 }
 0x3b2   :  { %1364 = vmatmul.mubr.bf16.vlgmr.msra.gmra.mrb[12].mxu0 %v862_v30  ;;  %1332 = vmatpush3.bf16.msra.mxu1 %v1449_v29 }
 0x3b3   :  { %1333 = vmatprep.subr.bf16.mxu1 %v1769_v0 }
 0x3b6   :  { %1334 = vmatpush3.bf16.msra.mxu1 %v1450_v31 }
 0x3b7   :  { %1335 = vmatprep.subr.bf16.mxu1 %v1769_v0 }
 0x3ba   :  { %1336 = vmatpush3.bf16.msra.mxu1 %v1451_v32 }
 0x3bb   :  { %1337 = vmatprep.subr.bf16.mxu1 %v1769_v0 }
 0x3be   :  { %1338 = vmatpush3.bf16.msra.mxu1 %v1452_v33 }
 0x3bf   :  { %1339 = vmatprep.subr.bf16.mxu1 %v1769_v0 }
 0x3c2   :  { %1340 = vmatpush3.bf16.msra.mxu1 %v1453_v34 }
 0x3c3   :  { %1341 = vmatprep.subr.bf16.mxu1 %v1769_v0 }
 0x3c6   :  { %1342 = vmatpush3.bf16.msra.mxu1 %v1454_v35 }
 0x3c7   :  { %1367 = vmatprep.subr.bf16.mxu1 %v1769_v0 }
 0x465   :  { %v742_v37 = vpop.f32.mrb[8].mxu0 }
 0x466   :  { %v743_v38 = vadd.f32 %v1158_v36, %v742_v37  ;;  %v1325_v39 = vpop.f32.mrb[9].mxu0 }
 0x467   :  { %v745_v40 = vpop.f32.mrb[10].mxu0 }
 0x468   :  { %v748_v41 = vmax.f32 %v743_v38, 0.0  ;;  %v1326_v42 = vpop.f32.mrb[11].mxu0 }
 0x46a   :  { %v749_v44 = vpack.c.bf16 %v748_v41, %v748_v41 }
 0x46c   :  { %1344 = vmatmul.mubr.bf16.vlgmr.msra.gmra.mrb[12].mxu1 %v749_v44 }
 0x46d   :  { %1368 = vmatpush3.bf16.msra.mxu1 %v1455_v43  ;;  %1383 = vmatprep.mubr.msk.bf16.mxu1 %vm1770_vm0, %v1769_v0 }
 0x46e   :  { %1369 = vmatprep.subr.bf16.mxu1 %v1769_v0 }
 0x471   :  { %1370 = vmatpush3.bf16.msra.mxu1 %v1456_v45 }
 0x472   :  { %1371 = vmatprep.subr.bf16.mxu1 %v1769_v0 }
 0x475   :  { %1372 = vmatpush3.bf16.msra.mxu1 %v1457_v46 }
 0x476   :  { %1373 = vmatprep.subr.bf16.mxu1 %v1769_v0 }
 0x479   :  { %1374 = vmatpush3.bf16.msra.mxu1 %v1458_v47 }
 0x47a   :  { %1375 = vmatprep.subr.bf16.mxu1 %v1769_v0 }
 0x47c   :  { %v623_v50 = vpop.f32.mrb[8].mxu1 }
 0x47d   :  { %v624_v51 = vadd.f32 %v1148_v49, %v623_v50  ;;  %1376 = vmatpush3.bf16.msra.mxu1 %v1459_v48  ;;  %v1305_v52 = vpop.f32.mrb[9].mxu1 }
 0x47e   :  { %v626_v54 = vpop.f32.mrb[10].mxu1  ;;  %1377 = vmatprep.subr.bf16.mxu1 %v1769_v0 }
 0x47f   :  { %v1157_v55 = vmul.f32 -1.442695, %v624_v51  ;;  %v1306_v56 = vpop.f32.mrb[11].mxu1 }
 0x481   :  { %1471 = vpow2.f32 %v1157_v55  ;;  %1378 = vmatpush3.bf16.msra.mxu1 %v1460_v53 }
 0x482   :  { %1379 = vmatprep.subr.bf16.mxu1 %v1769_v0 }
 0x485   :  { %v968_v59 = vpop.f32.mrb[12].mxu0  ;;  %1380 = vmatpush3.bf16.msra.mxu1 %v1461_v57 }
 0x486   :  { %v969_v61 = vadd.f32 %v1176_v58, %v968_v59  ;;  %v1365_v62 = vpop.f32.mrb[13].mxu0  ;;  %1381 = vmatprep.subr.bf16.mxu1 %v1769_v0 }
 0x487   :  { %v971_v63 = vpop.f32.mrb[14].mxu0 }
 0x488   :  { %v974_v1 = vmax.f32 %v969_v61, 0.0  ;;  %v1366_v2 = vpop.f32.mrb[15].mxu0 }
 0x489   :  { %1382 = vmatpush3.bf16.msra.mxu1 %v1462_v60 }
 0x48a   :  { %v975_v3 = vpack.c.bf16 %v974_v1, %v974_v1 }
 0x48b   :  { %v1472_v4 = vpop.eup %1471 }
 0x48c   :  { %v632_v5 = vadd.f32 1.0, %v1472_v4  ;;  %1384 = vmatmul.mubr.bf16.vlgmr.msra.gmra.mrb[16].mxu1 %v975_v3 }
 0x48e   :  { %1473 = vrcp.f32 %v632_v5 }
 0x498   :  { %v1474_v6 = vpop.eup %1473 }
 0x499   :  { %635 = vst [vmem:[%s2212_s17] sm:$0xff] %v1474_v6 }
 0x53f   :  { %v855_v8 = vpop.f32.mrb[12].mxu1 }
 0x540   :  { %v856_v9 = vadd.f32 %v1167_v7, %v855_v8  ;;  %v1345_v0 = vpop.f32.mrb[13].mxu1 }
 0x541   :  { %v858_v10 = vpop.f32.mrb[14].mxu1 }
 0x542   :  { %861 = vst [vmem:[#allocation19] sm:$0xff] %v856_v9  ;;  %v1346_v11 = vpop.f32.mrb[15].mxu1 }
 0x543   :  { %1706 = shalt.err (!%p1703_p0)
}
 0x544   :  { %s1707_s17 = scalar_lea.hbm %s2213_s18, 128 }
 0x545   :  { %p1708_p1 = scmp.ne.s32.totalorder %s2213_s18, %s1707_s17  ;;  %p1711_p2 = scmp.lt.u32.totalorder %s1707_s17, %s2213_s18 }
 0x547   :  { %p1713_p3 = pnand %p1711_p2, %p1708_p1 }
 0x549   :  { %1716 = shalt.err (!%p1713_p3)
}
 0x54a   :  { %1099 = dma.vmem_to_hbm [thread:$0]  %s1097_s20, 128, %s2213_s18, [#allocation4]   ;;  %v1185_v12 = vld [vmem:[%s2211_s16] ss:$0 sm:$0xff] }
 0x54b   :  { %s1773_s5 = smov [#allocation20]  }
 0x54c   :  { %s1106_s14 = sshll.u32 %s1773_s5, 4  ;;  %s1107_s14 = int_to_ptr.vmem [resolvable:$true] %s1106_s14 }
 0x54d   :  { %s1717_s9 = scalar_lea.vmem %s1107_s14, 128  ;;  %p1722_p5 = scmp.lt.s32.totalorder %s1107_s14, %s1107_s14 }
 0x54e   :  { %p1718_p4 = scmp.ne.s32.totalorder %s1107_s14, %s1717_s9  ;;  %p1723_p6 = scmp.lt.s32.totalorder %s1717_s9, %s1717_s9 }
 0x550   :  { %p1724_p7 = por %p1723_p6, %p1722_p5 }
 0x552   :  { %p1725_p8 = pnand %p1724_p7, %p1718_p4 }
 0x55f   :  { %v1081_v13 = vpop.f32.mrb[16].mxu1 }
 0x560   :  { %v1082_v14 = vadd.f32 %v1185_v12, %v1081_v13  ;;  %v1385_v15 = vpop.f32.mrb[17].mxu1 }
 0x561   :  { %v1084_v16 = vpop.f32.mrb[18].mxu1 }
 0x562   :  { %1087 = vst [vmem:[#allocation20] sm:$0xff] %v1082_v14  ;;  %v1386_v17 = vpop.f32.mrb[19].mxu1 }
 0x563   :  { %1728 = shalt.err (!%p1725_p8)
}
 0x564   :  { %s1729_s16 = scalar_lea.hbm %s2214_s19, 128 }
 0x565   :  { %p1730_p9 = scmp.ne.s32.totalorder %s2214_s19, %s1729_s16  ;;  %p1733_p10 = scmp.lt.u32.totalorder %s1729_s16, %s2214_s19 }
 0x567   :  { %p1735_p11 = pnand %p1733_p10, %p1730_p9 }
 0x569   :  { %1738 = shalt.err (!%p1735_p11)
}
 0x56a   :  { %1109 = dma.vmem_to_hbm [thread:$0]  %s1107_s14, 128, %s2214_s19, [#allocation21]  }
 0x56b   :  { %1751 = dma.done.wait [#allocation4], 128  }
 0x56c   :  { %1752 = vsyncadd [#allocation4], 4294967168 }
 0x56d   :  { %1753 = dma.done.wait [#allocation21], 128  }
 0x56e   :  { %1754 = vsyncadd [#allocation21], 4294967168 }
 0x56f   :  { %1118 = vsyncpa [#allocation3], 1 }
 0x570   :  { %1119 = vsyncpa [#allocation6], 1 }
 0x571   :  { %1120 = vsyncpa [#allocation9], 1 }
 0x572   :  { %1121 = vsyncpa [#allocation12], 1 }
 0x573   :  { %1122 = vsyncpa [#allocation15], 1 }
 0x574   :  { %1123 = vsyncpa [#allocation18], 1 }
 0x575   :  { %1124 = vsyncpa [#allocation4], 1 }
 0x576   :  { %1125 = vsyncpa [#allocation21], 1 }

</bundles_post_ra>
